<compile_context>
chip_gen: v7x
topology: tpu7x:2x2x1
jax: 0.10.0
libtpu: 0.0.40
codegen_flags: <defaults>
</compile_context>

<pallas_src>
import functools
import math

import jax
import jax.numpy as jnp
from jax import lax
from jax.experimental import pallas as pl
from jax.experimental.pallas import tpu as pltpu


# ---------------------------------------------------------------------------
# Fused kernel: projections + multi-head attention for one (batch, q-tile)
# ---------------------------------------------------------------------------
def _cross_attn_kernel(x_ref, c_ref, wq_ref, wkv_ref, o_ref, *, heads, scale):
    # x_ref:  (tq, dim)        -- q-row tile of x (already flattened to (B, N, dim))
    # c_ref:  (M, ctx_dim)     -- full context for this batch
    # wq_ref: (dim, dim)       -- to_q.weight.T
    # wkv_ref:(ctx_dim, 2*dim) -- to_kv.weight.T
    # o_ref:  (tq, dim)        -- output tile, 'b n (h d)' layout (lane-dense)
    x = x_ref[...]
    c = c_ref[...]

    # Fused projections on the MXU (f32 accumulation).  Fold the softmax scale into q
    # (tq x dim) rather than scaling the (tq, M) score matrix per head.
    q = jnp.dot(x, wq_ref[...], preferred_element_type=jnp.float32) * scale
    kv = jnp.dot(c, wkv_ref[...], preferred_element_type=jnp.float32)

    dim = q.shape[-1]
    d = dim // heads
    k = kv[:, :dim]   # (M, dim)
    v = kv[:, dim:]   # (M, dim)

    outs = []
    for h in range(heads):  # heads is small & static -> fully unrolled
        lo, hi = h * d, (h + 1) * d
        qh = q[:, lo:hi]    # (tq, d)
        kh = k[:, lo:hi]    # (M, d)
        vh = v[:, lo:hi]    # (M, d)

        # scores: contract over d directly -- no materialized k.T relayout
        s = lax.dot_general(
            qh, kh, (((1,), (1,)), ((), ())),
            preferred_element_type=jnp.float32,
        )  # (tq, M)

        # numerically stable softmax over the context axis (f32)
        s = s - jnp.max(s, axis=-1, keepdims=True)
        p = jnp.exp(s)
        inv = pl.reciprocal(jnp.sum(p, axis=-1, keepdims=True), approx=True)
        attn = p * inv

        outs.append(jnp.dot(attn, vh, preferred_element_type=jnp.float32))  # (tq, d)

    # One lane-dense store of the full 'h d' width -> no post-kernel transpose needed.
    o_ref[...] = jnp.concatenate(outs, axis=-1).astype(o_ref.dtype)


def _pick_q_tile(n):
    """Largest q-row tile that divides n and is a multiple of 8; else the full extent."""
    for t in (512, 256, 128, 64, 32, 16, 8):
        if t <= n and n % t == 0:
            return t
    return n


# ---------------------------------------------------------------------------
# CrossAttention forward
# ---------------------------------------------------------------------------
def cross_attention(x, context, wq_t, wkv_t, *, dim, heads):
    """
    x:        (B, ..., dim)
    context:  (B, ..., context_dim)
    wq_t:     (dim, dim)            -- to_q.weight.T
    wkv_t:    (context_dim, 2*dim)  -- to_kv.weight.T
    Returns an array with the same shape as x.
    """
    shape = x.shape
    assert shape[-1] == dim, f"{shape[-1]}, {dim}"
    B = shape[0]
    ctx_dim = context.shape[-1]

    xf = x.reshape(B, -1, dim)            # flatten(1, -2)
    cf = context.reshape(B, -1, ctx_dim)
    N, M = xf.shape[1], cf.shape[1]

    tq = _pick_q_tile(N)
    grid = (B, N // tq)

    kernel = functools.partial(_cross_attn_kernel, heads=heads, scale=dim ** (-0.5))

    out = pl.pallas_call(
        kernel,
        out_shape=jax.ShapeDtypeStruct((B, N, dim), x.dtype),
        grid=grid,
        in_specs=[
            pl.BlockSpec((None, tq, dim), lambda b, i: (b, i, 0)),        # x tile
            pl.BlockSpec((None, M, ctx_dim), lambda b, i: (b, 0, 0)),     # full context (resident per batch)
            pl.BlockSpec((dim, dim), lambda b, i: (0, 0)),                # wq_t (resident)
            pl.BlockSpec((ctx_dim, 2 * dim), lambda b, i: (0, 0)),        # wkv_t (resident)
        ],
        out_specs=pl.BlockSpec((None, tq, dim), lambda b, i: (b, i, 0)),  # 'b n (h d)' layout
        compiler_params=pltpu.CompilerParams(
            dimension_semantics=("parallel", "parallel"),
            vmem_limit_bytes=32 * 1024 * 1024,
        ),
    )(xf, cf, wq_t, wkv_t)

    return out.reshape(shape)


# ---------------------------------------------------------------------------
# Pure-JAX reference for a correctness check
# ---------------------------------------------------------------------------
def _reference(x, context, wq_t, wkv_t, *, dim, heads):
    shape = x.shape
    B = shape[0]
    xf = x.reshape(B, -1, dim)
    cf = context.reshape(B, -1, context.shape[-1])
    q = xf @ wq_t
    kv = cf @ wkv_t
    k, v = kv[..., :dim], kv[..., dim:]
    d = dim // heads

    def to_heads(t):
        b, n, _ = t.shape
        return t.reshape(b, n, heads, d).transpose(0, 2, 1, 3)

    qh, kh, vh = to_heads(q), to_heads(k), to_heads(v)
    dots = jnp.einsum("bhid,bhjd->bhij", qh, kh) * dim ** (-0.5)
    attn = jax.nn.softmax(dots, axis=-1)
    out = jnp.einsum("bhij,bhjd->bhid", attn, vh)
    out = out.transpose(0, 2, 1, 3).reshape(B, xf.shape[1], dim).reshape(shape)
    return out


if __name__ == "__main__":
    dim, heads = 32, 8
    context_dim = dim          # default (context_dim=None)
    B = 2
    x_shape = (B, 4, 4, dim)   # flatten(1, -2) -> N = 16 query tokens
    c_shape = (B, 8, context_dim)  # M = 8 context tokens

    key = jax.random.PRNGKey(0)
    kx, kc, kwq, kwkv = jax.random.split(key, 4)

    x = jax.random.normal(kx, x_shape, dtype=jnp.float32)
    context = jax.random.normal(kc, c_shape, dtype=jnp.float32)

    # nn.Linear default init: U(-1/sqrt(in_features), 1/sqrt(in_features)).
    # PyTorch stores weight as (out, in) and computes x @ W.T; we pre-transpose.
    bq = 1.0 / math.sqrt(dim)
    bkv = 1.0 / math.sqrt(context_dim)
    wq = jax.random.uniform(kwq, (dim, dim), jnp.float32, -bq, bq)
    wkv = jax.random.uniform(kwkv, (2 * dim, context_dim), jnp.float32, -bkv, bkv)
    wq_t, wkv_t = wq.T, wkv.T

    out = cross_attention(x, context, wq_t, wkv_t, dim=dim, heads=heads)
    out = jax.block_until_ready(out)
    assert out.shape == x.shape

    ref = _reference(x, context, wq_t, wkv_t, dim=dim, heads=heads)
    # approx=True reciprocal (EUP) trades a few ulps for a free softmax denominator
    assert jnp.allclose(out, ref, atol=2e-3, rtol=2e-3), "mismatch vs reference"

    print("KERNEL_OK")
</pallas_src>

<mosaic_0001>
module attributes {stable_mosaic.version = 11 : i64} {
  func.func @_cross_attn_kernel(%arg0: i32, %arg1: i32, %arg2: memref<1x16x32xf32, #tpu.memory_space<vmem>>, %arg3: memref<1x8x32xf32, #tpu.memory_space<vmem>>, %arg4: memref<32x32xf32, #tpu.memory_space<vmem>>, %arg5: memref<32x64xf32, #tpu.memory_space<vmem>>, %arg6: memref<1x16x32xf32, #tpu.memory_space<vmem>>) attributes {dimension_semantics = [#tpu.dimension_semantics<parallel>, #tpu.dimension_semantics<parallel>], iteration_bounds = array<i64: 2, 1>, scalar_prefetch = 0 : i64, scratch_operands = 0 : i64, tpu.core_type = #tpu.core_type<tc>, window_params = [{transform_indices = @transform_0, window_bounds = array<i64: 1, 16, 32>}, {transform_indices = @transform_1, window_bounds = array<i64: 1, 8, 32>}, {pipeline_mode = #tpu.pipeline_mode<synchronous>, transform_indices = @transform_2, window_bounds = array<i64: 32, 32>}, {pipeline_mode = #tpu.pipeline_mode<synchronous>, transform_indices = @transform_3, window_bounds = array<i64: 32, 64>}, {transform_indices = @transform_4, window_bounds = array<i64: 1, 16, 32>}]} {
    %c0 = arith.constant 0 : index
    %c0_0 = arith.constant 0 : index
    %c0_1 = arith.constant 0 : index
    %0 = vector.load %arg2[%c0, %c0_0, %c0_1] : memref<1x16x32xf32, #tpu.memory_space<vmem>>, vector<1x16x32xf32>
    %1 = vector.shape_cast %0 : vector<1x16x32xf32> to vector<16x32xf32>
    %c0_2 = arith.constant 0 : index
    %c0_3 = arith.constant 0 : index
    %c0_4 = arith.constant 0 : index
    %2 = vector.load %arg3[%c0_2, %c0_3, %c0_4] : memref<1x8x32xf32, #tpu.memory_space<vmem>>, vector<1x8x32xf32>
    %3 = vector.shape_cast %2 : vector<1x8x32xf32> to vector<8x32xf32>
    %c0_5 = arith.constant 0 : index
    %c0_6 = arith.constant 0 : index
    %4 = vector.load %arg4[%c0_5, %c0_6] : memref<32x32xf32, #tpu.memory_space<vmem>>, vector<32x32xf32>
    %cst = arith.constant dense<0.000000e+00> : vector<16x32xf32>
    %5 = tpu.matmul %1, %4, %cst {dimension_numbers = #tpu.dot_dimension_numbers<[1], [0], [0], [1], [0, 0, 1, 1], [], []>} : vector<16x32xf32>, vector<32x32xf32>, vector<16x32xf32> -> vector<16x32xf32>
    %cst_7 = arith.constant 0.176776692 : f32
    %6 = vector.broadcast %cst_7 : f32 to vector<16x32xf32>
    %7 = arith.mulf %5, %6 : vector<16x32xf32>
    %c0_8 = arith.constant 0 : index
    %c0_9 = arith.constant 0 : index
    %8 = vector.load %arg5[%c0_8, %c0_9] : memref<32x64xf32, #tpu.memory_space<vmem>>, vector<32x64xf32>
    %cst_10 = arith.constant dense<0.000000e+00> : vector<8x64xf32>
    %9 = tpu.matmul %3, %8, %cst_10 {dimension_numbers = #tpu.dot_dimension_numbers<[1], [0], [0], [1], [0, 0, 1, 1], [], []>} : vector<8x32xf32>, vector<32x64xf32>, vector<8x64xf32> -> vector<8x64xf32>
    %10 = vector.extract_strided_slice %9 {offsets = [0, 0], sizes = [8, 32], strides = [1, 1]} : vector<8x64xf32> to vector<8x32xf32>
    %11 = vector.extract_strided_slice %9 {offsets = [0, 32], sizes = [8, 32], strides = [1, 1]} : vector<8x64xf32> to vector<8x32xf32>
    %12 = vector.extract_strided_slice %7 {offsets = [0, 0], sizes = [16, 4], strides = [1, 1]} : vector<16x32xf32> to vector<16x4xf32>
    %13 = vector.extract_strided_slice %10 {offsets = [0, 0], sizes = [8, 4], strides = [1, 1]} : vector<8x32xf32> to vector<8x4xf32>
    %14 = vector.extract_strided_slice %11 {offsets = [0, 0], sizes = [8, 4], strides = [1, 1]} : vector<8x32xf32> to vector<8x4xf32>
    %cst_11 = arith.constant dense<0.000000e+00> : vector<16x8xf32>
    %15 = tpu.matmul %12, %13, %cst_11 {dimension_numbers = #tpu.dot_dimension_numbers<[1], [1], [0], [0], [0, 0, 1, 0], [], []>} : vector<16x4xf32>, vector<8x4xf32>, vector<16x8xf32> -> vector<16x8xf32>
    %cst_12 = arith.constant dense<0xFF800000> : vector<16xf32>
    %16 = vector.multi_reduction <maximumf>, %15, %cst_12 [1] : vector<16x8xf32> to vector<16xf32>
    %17 = vector.shape_cast %16 : vector<16xf32> to vector<16x1xf32>
    %18 = vector.broadcast %17 : vector<16x1xf32> to vector<16x8xf32>
    %19 = arith.subf %15, %18 : vector<16x8xf32>
    %20 = math.exp %19 : vector<16x8xf32>
    %cst_13 = arith.constant dense<0.000000e+00> : vector<16xf32>
    %21 = vector.multi_reduction <add>, %20, %cst_13 [1] : vector<16x8xf32> to vector<16xf32>
    %22 = vector.shape_cast %21 : vector<16xf32> to vector<16x1xf32>
    %23 = tpu.reciprocal %22 {approx = true} : vector<16x1xf32> -> vector<16x1xf32>
    %24 = vector.broadcast %23 : vector<16x1xf32> to vector<16x8xf32>
    %25 = arith.mulf %20, %24 : vector<16x8xf32>
    %cst_14 = arith.constant dense<0.000000e+00> : vector<16x4xf32>
    %26 = tpu.matmul %25, %14, %cst_14 {dimension_numbers = #tpu.dot_dimension_numbers<[1], [0], [0], [1], [0, 0, 1, 1], [], []>} : vector<16x8xf32>, vector<8x4xf32>, vector<16x4xf32> -> vector<16x4xf32>
    %27 = vector.extract_strided_slice %7 {offsets = [0, 4], sizes = [16, 4], strides = [1, 1]} : vector<16x32xf32> to vector<16x4xf32>
    %28 = vector.extract_strided_slice %10 {offsets = [0, 4], sizes = [8, 4], strides = [1, 1]} : vector<8x32xf32> to vector<8x4xf32>
    %29 = vector.extract_strided_slice %11 {offsets = [0, 4], sizes = [8, 4], strides = [1, 1]} : vector<8x32xf32> to vector<8x4xf32>
    %cst_15 = arith.constant dense<0.000000e+00> : vector<16x8xf32>
    %30 = tpu.matmul %27, %28, %cst_15 {dimension_numbers = #tpu.dot_dimension_numbers<[1], [1], [0], [0], [0, 0, 1, 0], [], []>} : vector<16x4xf32>, vector<8x4xf32>, vector<16x8xf32> -> vector<16x8xf32>
    %cst_16 = arith.constant dense<0xFF800000> : vector<16xf32>
    %31 = vector.multi_reduction <maximumf>, %30, %cst_16 [1] : vector<16x8xf32> to vector<16xf32>
    %32 = vector.shape_cast %31 : vector<16xf32> to vector<16x1xf32>
    %33 = vector.broadcast %32 : vector<16x1xf32> to vector<16x8xf32>
    %34 = arith.subf %30, %33 : vector<16x8xf32>
    %35 = math.exp %34 : vector<16x8xf32>
    %cst_17 = arith.constant dense<0.000000e+00> : vector<16xf32>
    %36 = vector.multi_reduction <add>, %35, %cst_17 [1] : vector<16x8xf32> to vector<16xf32>
    %37 = vector.shape_cast %36 : vector<16xf32> to vector<16x1xf32>
    %38 = tpu.reciprocal %37 {approx = true} : vector<16x1xf32> -> vector<16x1xf32>
    %39 = vector.broadcast %38 : vector<16x1xf32> to vector<16x8xf32>
    %40 = arith.mulf %35, %39 : vector<16x8xf32>
    %cst_18 = arith.constant dense<0.000000e+00> : vector<16x4xf32>
    %41 = tpu.matmul %40, %29, %cst_18 {dimension_numbers = #tpu.dot_dimension_numbers<[1], [0], [0], [1], [0, 0, 1, 1], [], []>} : vector<16x8xf32>, vector<8x4xf32>, vector<16x4xf32> -> vector<16x4xf32>
    %42 = vector.extract_strided_slice %7 {offsets = [0, 8], sizes = [16, 4], strides = [1, 1]} : vector<16x32xf32> to vector<16x4xf32>
    %43 = vector.extract_strided_slice %10 {offsets = [0, 8], sizes = [8, 4], strides = [1, 1]} : vector<8x32xf32> to vector<8x4xf32>
    %44 = vector.extract_strided_slice %11 {offsets = [0, 8], sizes = [8, 4], strides = [1, 1]} : vector<8x32xf32> to vector<8x4xf32>
    %cst_19 = arith.constant dense<0.000000e+00> : vector<16x8xf32>
    %45 = tpu.matmul %42, %43, %cst_19 {dimension_numbers = #tpu.dot_dimension_numbers<[1], [1], [0], [0], [0, 0, 1, 0], [], []>} : vector<16x4xf32>, vector<8x4xf32>, vector<16x8xf32> -> vector<16x8xf32>
    %cst_20 = arith.constant dense<0xFF800000> : vector<16xf32>
    %46 = vector.multi_reduction <maximumf>, %45, %cst_20 [1] : vector<16x8xf32> to vector<16xf32>
    %47 = vector.shape_cast %46 : vector<16xf32> to vector<16x1xf32>
    %48 = vector.broadcast %47 : vector<16x1xf32> to vector<16x8xf32>
    %49 = arith.subf %45, %48 : vector<16x8xf32>
    %50 = math.exp %49 : vector<16x8xf32>
    %cst_21 = arith.constant dense<0.000000e+00> : vector<16xf32>
    %51 = vector.multi_reduction <add>, %50, %cst_21 [1] : vector<16x8xf32> to vector<16xf32>
    %52 = vector.shape_cast %51 : vector<16xf32> to vector<16x1xf32>
    %53 = tpu.reciprocal %52 {approx = true} : vector<16x1xf32> -> vector<16x1xf32>
    %54 = vector.broadcast %53 : vector<16x1xf32> to vector<16x8xf32>
    %55 = arith.mulf %50, %54 : vector<16x8xf32>
    %cst_22 = arith.constant dense<0.000000e+00> : vector<16x4xf32>
    %56 = tpu.matmul %55, %44, %cst_22 {dimension_numbers = #tpu.dot_dimension_numbers<[1], [0], [0], [1], [0, 0, 1, 1], [], []>} : vector<16x8xf32>, vector<8x4xf32>, vector<16x4xf32> -> vector<16x4xf32>
    %57 = vector.extract_strided_slice %7 {offsets = [0, 12], sizes = [16, 4], strides = [1, 1]} : vector<16x32xf32> to vector<16x4xf32>
    %58 = vector.extract_strided_slice %10 {offsets = [0, 12], sizes = [8, 4], strides = [1, 1]} : vector<8x32xf32> to vector<8x4xf32>
    %59 = vector.extract_strided_slice %11 {offsets = [0, 12], sizes = [8, 4], strides = [1, 1]} : vector<8x32xf32> to vector<8x4xf32>
    %cst_23 = arith.constant dense<0.000000e+00> : vector<16x8xf32>
    %60 = tpu.matmul %57, %58, %cst_23 {dimension_numbers = #tpu.dot_dimension_numbers<[1], [1], [0], [0], [0, 0, 1, 0], [], []>} : vector<16x4xf32>, vector<8x4xf32>, vector<16x8xf32> -> vector<16x8xf32>
    %cst_24 = arith.constant dense<0xFF800000> : vector<16xf32>
    %61 = vector.multi_reduction <maximumf>, %60, %cst_24 [1] : vector<16x8xf32> to vector<16xf32>
    %62 = vector.shape_cast %61 : vector<16xf32> to vector<16x1xf32>
    %63 = vector.broadcast %62 : vector<16x1xf32> to vector<16x8xf32>
    %64 = arith.subf %60, %63 : vector<16x8xf32>
    %65 = math.exp %64 : vector<16x8xf32>
    %cst_25 = arith.constant dense<0.000000e+00> : vector<16xf32>
    %66 = vector.multi_reduction <add>, %65, %cst_25 [1] : vector<16x8xf32> to vector<16xf32>
    %67 = vector.shape_cast %66 : vector<16xf32> to vector<16x1xf32>
    %68 = tpu.reciprocal %67 {approx = true} : vector<16x1xf32> -> vector<16x1xf32>
    %69 = vector.broadcast %68 : vector<16x1xf32> to vector<16x8xf32>
    %70 = arith.mulf %65, %69 : vector<16x8xf32>
    %cst_26 = arith.constant dense<0.000000e+00> : vector<16x4xf32>
    %71 = tpu.matmul %70, %59, %cst_26 {dimension_numbers = #tpu.dot_dimension_numbers<[1], [0], [0], [1], [0, 0, 1, 1], [], []>} : vector<16x8xf32>, vector<8x4xf32>, vector<16x4xf32> -> vector<16x4xf32>
    %72 = vector.extract_strided_slice %7 {offsets = [0, 16], sizes = [16, 4], strides = [1, 1]} : vector<16x32xf32> to vector<16x4xf32>
    %73 = vector.extract_strided_slice %10 {offsets = [0, 16], sizes = [8, 4], strides = [1, 1]} : vector<8x32xf32> to vector<8x4xf32>
    %74 = vector.extract_strided_slice %11 {offsets = [0, 16], sizes = [8, 4], strides = [1, 1]} : vector<8x32xf32> to vector<8x4xf32>
    %cst_27 = arith.constant dense<0.000000e+00> : vector<16x8xf32>
    %75 = tpu.matmul %72, %73, %cst_27 {dimension_numbers = #tpu.dot_dimension_numbers<[1], [1], [0], [0], [0, 0, 1, 0], [], []>} : vector<16x4xf32>, vector<8x4xf32>, vector<16x8xf32> -> vector<16x8xf32>
    %cst_28 = arith.constant dense<0xFF800000> : vector<16xf32>
    %76 = vector.multi_reduction <maximumf>, %75, %cst_28 [1] : vector<16x8xf32> to vector<16xf32>
    %77 = vector.shape_cast %76 : vector<16xf32> to vector<16x1xf32>
    %78 = vector.broadcast %77 : vector<16x1xf32> to vector<16x8xf32>
    %79 = arith.subf %75, %78 : vector<16x8xf32>
    %80 = math.exp %79 : vector<16x8xf32>
    %cst_29 = arith.constant dense<0.000000e+00> : vector<16xf32>
    %81 = vector.multi_reduction <add>, %80, %cst_29 [1] : vector<16x8xf32> to vector<16xf32>
    %82 = vector.shape_cast %81 : vector<16xf32> to vector<16x1xf32>
    %83 = tpu.reciprocal %82 {approx = true} : vector<16x1xf32> -> vector<16x1xf32>
    %84 = vector.broadcast %83 : vector<16x1xf32> to vector<16x8xf32>
    %85 = arith.mulf %80, %84 : vector<16x8xf32>
    %cst_30 = arith.constant dense<0.000000e+00> : vector<16x4xf32>
    %86 = tpu.matmul %85, %74, %cst_30 {dimension_numbers = #tpu.dot_dimension_numbers<[1], [0], [0], [1], [0, 0, 1, 1], [], []>} : vector<16x8xf32>, vector<8x4xf32>, vector<16x4xf32> -> vector<16x4xf32>
    %87 = vector.extract_strided_slice %7 {offsets = [0, 20], sizes = [16, 4], strides = [1, 1]} : vector<16x32xf32> to vector<16x4xf32>
    %88 = vector.extract_strided_slice %10 {offsets = [0, 20], sizes = [8, 4], strides = [1, 1]} : vector<8x32xf32> to vector<8x4xf32>
    %89 = vector.extract_strided_slice %11 {offsets = [0, 20], sizes = [8, 4], strides = [1, 1]} : vector<8x32xf32> to vector<8x4xf32>
    %cst_31 = arith.constant dense<0.000000e+00> : vector<16x8xf32>
    %90 = tpu.matmul %87, %88, %cst_31 {dimension_numbers = #tpu.dot_dimension_numbers<[1], [1], [0], [0], [0, 0, 1, 0], [], []>} : vector<16x4xf32>, vector<8x4xf32>, vector<16x8xf32> -> vector<16x8xf32>
    %cst_32 = arith.constant dense<0xFF800000> : vector<16xf32>
    %91 = vector.multi_reduction <maximumf>, %90, %cst_32 [1] : vector<16x8xf32> to vector<16xf32>
    %92 = vector.shape_cast %91 : vector<16xf32> to vector<16x1xf32>
    %93 = vector.broadcast %92 : vector<16x1xf32> to vector<16x8xf32>
    %94 = arith.subf %90, %93 : vector<16x8xf32>
    %95 = math.exp %94 : vector<16x8xf32>
    %cst_33 = arith.constant dense<0.000000e+00> : vector<16xf32>
    %96 = vector.multi_reduction <add>, %95, %cst_33 [1] : vector<16x8xf32> to vector<16xf32>
    %97 = vector.shape_cast %96 : vector<16xf32> to vector<16x1xf32>
    %98 = tpu.reciprocal %97 {approx = true} : vector<16x1xf32> -> vector<16x1xf32>
    %99 = vector.broadcast %98 : vector<16x1xf32> to vector<16x8xf32>
    %100 = arith.mulf %95, %99 : vector<16x8xf32>
    %cst_34 = arith.constant dense<0.000000e+00> : vector<16x4xf32>
    %101 = tpu.matmul %100, %89, %cst_34 {dimension_numbers = #tpu.dot_dimension_numbers<[1], [0], [0], [1], [0, 0, 1, 1], [], []>} : vector<16x8xf32>, vector<8x4xf32>, vector<16x4xf32> -> vector<16x4xf32>
    %102 = vector.extract_strided_slice %7 {offsets = [0, 24], sizes = [16, 4], strides = [1, 1]} : vector<16x32xf32> to vector<16x4xf32>
    %103 = vector.extract_strided_slice %10 {offsets = [0, 24], sizes = [8, 4], strides = [1, 1]} : vector<8x32xf32> to vector<8x4xf32>
    %104 = vector.extract_strided_slice %11 {offsets = [0, 24], sizes = [8, 4], strides = [1, 1]} : vector<8x32xf32> to vector<8x4xf32>
    %cst_35 = arith.constant dense<0.000000e+00> : vector<16x8xf32>
    %105 = tpu.matmul %102, %103, %cst_35 {dimension_numbers = #tpu.dot_dimension_numbers<[1], [1], [0], [0], [0, 0, 1, 0], [], []>} : vector<16x4xf32>, vector<8x4xf32>, vector<16x8xf32> -> vector<16x8xf32>
    %cst_36 = arith.constant dense<0xFF800000> : vector<16xf32>
    %106 = vector.multi_reduction <maximumf>, %105, %cst_36 [1] : vector<16x8xf32> to vector<16xf32>
    %107 = vector.shape_cast %106 : vector<16xf32> to vector<16x1xf32>
    %108 = vector.broadcast %107 : vector<16x1xf32> to vector<16x8xf32>
    %109 = arith.subf %105, %108 : vector<16x8xf32>
    %110 = math.exp %109 : vector<16x8xf32>
    %cst_37 = arith.constant dense<0.000000e+00> : vector<16xf32>
    %111 = vector.multi_reduction <add>, %110, %cst_37 [1] : vector<16x8xf32> to vector<16xf32>
    %112 = vector.shape_cast %111 : vector<16xf32> to vector<16x1xf32>
    %113 = tpu.reciprocal %112 {approx = true} : vector<16x1xf32> -> vector<16x1xf32>
    %114 = vector.broadcast %113 : vector<16x1xf32> to vector<16x8xf32>
    %115 = arith.mulf %110, %114 : vector<16x8xf32>
    %cst_38 = arith.constant dense<0.000000e+00> : vector<16x4xf32>
    %116 = tpu.matmul %115, %104, %cst_38 {dimension_numbers = #tpu.dot_dimension_numbers<[1], [0], [0], [1], [0, 0, 1, 1], [], []>} : vector<16x8xf32>, vector<8x4xf32>, vector<16x4xf32> -> vector<16x4xf32>
    %117 = vector.extract_strided_slice %7 {offsets = [0, 28], sizes = [16, 4], strides = [1, 1]} : vector<16x32xf32> to vector<16x4xf32>
    %118 = vector.extract_strided_slice %10 {offsets = [0, 28], sizes = [8, 4], strides = [1, 1]} : vector<8x32xf32> to vector<8x4xf32>
    %119 = vector.extract_strided_slice %11 {offsets = [0, 28], sizes = [8, 4], strides = [1, 1]} : vector<8x32xf32> to vector<8x4xf32>
    %cst_39 = arith.constant dense<0.000000e+00> : vector<16x8xf32>
    %120 = tpu.matmul %117, %118, %cst_39 {dimension_numbers = #tpu.dot_dimension_numbers<[1], [1], [0], [0], [0, 0, 1, 0], [], []>} : vector<16x4xf32>, vector<8x4xf32>, vector<16x8xf32> -> vector<16x8xf32>
    %cst_40 = arith.constant dense<0xFF800000> : vector<16xf32>
    %121 = vector.multi_reduction <maximumf>, %120, %cst_40 [1] : vector<16x8xf32> to vector<16xf32>
    %122 = vector.shape_cast %121 : vector<16xf32> to vector<16x1xf32>
    %123 = vector.broadcast %122 : vector<16x1xf32> to vector<16x8xf32>
    %124 = arith.subf %120, %123 : vector<16x8xf32>
    %125 = math.exp %124 : vector<16x8xf32>
    %cst_41 = arith.constant dense<0.000000e+00> : vector<16xf32>
    %126 = vector.multi_reduction <add>, %125, %cst_41 [1] : vector<16x8xf32> to vector<16xf32>
    %127 = vector.shape_cast %126 : vector<16xf32> to vector<16x1xf32>
    %128 = tpu.reciprocal %127 {approx = true} : vector<16x1xf32> -> vector<16x1xf32>
    %129 = vector.broadcast %128 : vector<16x1xf32> to vector<16x8xf32>
    %130 = arith.mulf %125, %129 : vector<16x8xf32>
    %cst_42 = arith.constant dense<0.000000e+00> : vector<16x4xf32>
    %131 = tpu.matmul %130, %119, %cst_42 {dimension_numbers = #tpu.dot_dimension_numbers<[1], [0], [0], [1], [0, 0, 1, 1], [], []>} : vector<16x8xf32>, vector<8x4xf32>, vector<16x4xf32> -> vector<16x4xf32>
    %132 = tpu.concatenate %26, %41, %56, %71, %86, %101, %116, %131 in 1 : vector<16x4xf32>, vector<16x4xf32>, vector<16x4xf32>, vector<16x4xf32>, vector<16x4xf32>, vector<16x4xf32>, vector<16x4xf32>, vector<16x4xf32> -> vector<16x32xf32>
    %c0_43 = arith.constant 0 : index
    %c0_44 = arith.constant 0 : index
    %c0_45 = arith.constant 0 : index
    %133 = vector.load %arg6[%c0_43, %c0_44, %c0_45] : memref<1x16x32xf32, #tpu.memory_space<vmem>>, vector<1x16x32xf32>
    %134 = vector.shape_cast %133 : vector<1x16x32xf32> to vector<16x32xf32>
    %135 = vector.shape_cast %132 : vector<16x32xf32> to vector<1x16x32xf32>
    tpu.vector_store %arg6[%c0_43, %c0_44, %c0_45], %135 {strides = array<i32>} : memref<1x16x32xf32, #tpu.memory_space<vmem>>, vector<1x16x32xf32>,
    return
  }
  func.func @transform_0(%arg0: i32, %arg1: i32) -> (i32, i32, i32) {
    %c0_i32 = arith.constant 0 : i32
    %c0_i32_0 = arith.constant 0 : i32
    return %arg0, %arg1, %c0_i32 : i32, i32, i32
  }
  func.func @transform_1(%arg0: i32, %arg1: i32) -> (i32, i32, i32) {
    %c0_i32 = arith.constant 0 : i32
    %c0_i32_0 = arith.constant 0 : i32
    %c0_i32_1 = arith.constant 0 : i32
    return %arg0, %c0_i32, %c0_i32_0 : i32, i32, i32
  }
  func.func @transform_2(%arg0: i32, %arg1: i32) -> (i32, i32) {
    %c0_i32 = arith.constant 0 : i32
    %c0_i32_0 = arith.constant 0 : i32
    %c0_i32_1 = arith.constant 0 : i32
    return %c0_i32, %c0_i32_0 : i32, i32
  }
  func.func @transform_3(%arg0: i32, %arg1: i32) -> (i32, i32) {
    %c0_i32 = arith.constant 0 : i32
    %c0_i32_0 = arith.constant 0 : i32
    %c0_i32_1 = arith.constant 0 : i32
    return %c0_i32, %c0_i32_0 : i32, i32
  }
  func.func @transform_4(%arg0: i32, %arg1: i32) -> (i32, i32, i32) {
    %c0_i32 = arith.constant 0 : i32
    %c0_i32_0 = arith.constant 0 : i32
    return %arg0, %arg1, %c0_i32 : i32, i32, i32
  }
}

</mosaic_0001>

<bundles_post_ra>
// kernel: tpu_custom_call.1
= control target key start
LH: loop header
LB: loop body
LE: loop exit
PB: predicated region body
PF: predicated region fallthrough
CT: control target
= control target key end

     0   :  { %s3479_s0 = inlined_call_operand.hbm [shape: f32[2,16,32], index: 0, kind: input, shape index: {}]   ;;  %s3480_s1 = inlined_call_operand.hbm [shape: f32[2,8,32], index: 1, kind: input, shape index: {}]   ;;  %s3481_s2 = inlined_call_operand.hbm [shape: f32[32,32], index: 2, kind: input, shape index: {}]   ;;  %s3482_s3 = inlined_call_operand.hbm [shape: f32[32,64], index: 3, kind: input, shape index: {}]   ;;  %s3483_s4 = inlined_call_operand.hbm [shape: f32[2,16,32], index: 4, kind: output, shape index: {}]  }
   0x1   :  { %3490 = sst [smem:[#allocation17_spill]] %s3479_s0 }
   0x2   :  { %3491 = sst [smem:[#allocation18_spill]] %s3481_s2 }
   0x3   :  { %3492 = sst [smem:[#allocation19_spill]] %s3482_s3 }
   0x4   :  { %9 = vsyncpa [#allocation3], 0 }
   0x5   :  { %11 = vsyncpa [#allocation3 + $0x1], 0 }
   0x6   :  { %12 = vsyncpa [#allocation6], 0 }
   0x7   :  { %14 = vsyncpa [#allocation6 + $0x1], 0 }
   0x8   :  { %15 = vsyncpa [#allocation9], 0 }
   0x9   :  { %16 = vsyncpa [#allocation4], 0 }
   0xa   :  { %18 = vsyncpa [#allocation4 + $0x1], 0  ;;  %s2927_s15 = smov 0   ;;  %s2929_s16 = smov 0  }
   0xb   :  { %s2931_s17 = smov 0   ;;  %s2933_s18 = smov 0  }
   0xc   :  { %s2935_s19 = smov 0   ;;  %s2937_s20 = smov 0  }
   0xd LB: > { %s2958_s21 = sadd.s32 4294967295, %s2867_s20   ;;  %s2236_s22 = sadd.s32 4294967294, %s2867_s20   ;;  %s2867_s20 = sphi %s2937_s20, %s24_s20   ;;  %s2863_s19 = sphi %s2935_s19, %s3520_s19   ;;  %s2859_s18 = sphi %s2933_s18, %s3519_s18   ;;  %s2855_s17 = sphi %s2931_s17, %s3518_s17   ;;  %s2851_s16 = sphi %s2929_s16, %s3517_s16   ;;  %s2847_s15 = sphi %s2927_s15, %s3516_s15  }
   0xe   : > { %p58_p0 = scmp.ne.s32.totalorder %s2851_s16, %s2847_s15  ;;  %p3484_p1 = scmp.eq.s32.totalorder %s2958_s21, 0 }
   0xf   : > { %p158_p3 = scmp.eq.s32.totalorder %s2236_s22, 1  ;;  %p2237_p5 = scmp.ge.s32.totalorder %s2867_s20, 1 }
  0x10   : > { %p2967_p4 = por %p3484_p1, %p58_p0  ;;  %p165_p7 = scmp.lt.s32.totalorder %s2867_s20, 3 }
  0x11   : > { %p2972_p6 = por %p158_p3, %p58_p0  ;;  %s2869_s26 = smov [#allocation7]  }
  0x12   : > { %s3493_s23 = scalar_select %p2967_p4, 1, 0 }
  0x13   : > { %s3494_s24 = scalar_select %p2972_p6, 1, 0 }
  0x14   : > { %p2977_p8 = pnand %p2237_p5, %p165_p7  ;;  %s177_s27 = sshll.u32 %s2869_s26, 4  ;;  %s2981_s27 = int_to_ptr.vmem [resolvable:$true] %s177_s27 }
  0x15   : > { %s2870_s29 = smov [#allocation8]   ;;  %s3497_s2 = sld [smem:[#allocation18_spill]] }
  0x16   : > { %s3495_s25 = scalar_select %p2977_p8, 1, 0 }
  0x17   : > { %p2491_p9 = pneg %p2977_p8  ;;  %s190_s30 = sshll.u32 %s2870_s29, 4  ;;  %s2992_s30 = int_to_ptr.vmem [resolvable:$true] %s190_s30 }
  0x19   : > { %p2988_p11 = pnand %p2491_p9, %p3484_p1 }
  0x1b   : > { %s2657_s7 = scalar_lea.hbm %s3497_s2, 512  ;;  %p2659_p13 = pneg %p2988_p11 }
  0x1c   : > { %p2658_p12 = scmp.ne.s32.totalorder %s3497_s2, %s2657_s7  ;;  %p2664_p5 = scmp.lt.u32.totalorder %s2657_s7, %s3497_s2 }
  0x1e   : > { %p2660_p0 = pnand %p2659_p13, %p2658_p12 }
  0x20   : > { %p2661_p3 = pneg %p2660_p0 }
  0x22   : > { %p2666_p7 = pnand %p2664_p5, %p2661_p3 }
  0x24   : > { %2669 = shalt.err (!%p2666_p7)
}
  0x25   : > { %s2670_s12 = scalar_lea.vmem %s2981_s27, 512  ;;  %p2678_p2 = scmp.lt.s32.totalorder %s2981_s27, %s2981_s27 }
  0x26   : > { %p2671_p9 = scmp.ne.s32.totalorder %s2981_s27, %s2670_s12  ;;  %p2679_p12 = scmp.lt.s32.totalorder %s2670_s12, %s2670_s12 }
  0x28   : > { %p2673_p10 = pnand %p2671_p9, %p2659_p13  ;;  %p2680_p0 = por %p2679_p12, %p2678_p2 }
  0x2a   : > { %p2674_p1 = pneg %p2673_p10 }
  0x2c   : > { %p2681_p6 = pnand %p2680_p0, %p2674_p1 }
  0x2e   : > { %2684 = shalt.err (!%p2681_p6)
}
  0x2f   : > { %s3485_s13 = smov 128   ;;  %s2872_s14 = smov 8  }
  0x30   : > { %2494 = dma.hbm_to_vmem [thread:$0]  (!%p2988_p11), %s3497_s2, 512, %s2981_s27, [#allocation6], %s3485_s13, %s3485_s13, %s2872_s14  }
  0x31   : > { %s3498_s3 = sld [smem:[#allocation19_spill]] }
  0x37   : > { %s2685_s6 = scalar_lea.hbm %s3498_s3, 512 }
  0x38   : > { %p2686_p1 = scmp.ne.s32.totalorder %s3498_s3, %s2685_s6  ;;  %p2692_p10 = scmp.lt.u32.totalorder %s2685_s6, %s3498_s3 }
  0x3a   : > { %p2688_p2 = pnand %p2686_p1, %p2659_p13 }
  0x3c   : > { %p2689_p6 = pneg %p2688_p2 }
  0x3e   : > { %p2694_p3 = pnand %p2692_p10, %p2689_p6 }
  0x40   : > { %2697 = shalt.err (!%p2694_p3)
}
  0x41   : > { %s2698_s27 = scalar_lea.vmem %s2992_s30, 512  ;;  %p2706_p12 = scmp.lt.s32.totalorder %s2992_s30, %s2992_s30 }
  0x42   : > { %p2699_p5 = scmp.ne.s32.totalorder %s2992_s30, %s2698_s27  ;;  %p2707_p0 = scmp.lt.s32.totalorder %s2698_s27, %s2698_s27 }
  0x44   : > { %p2701_p7 = pnand %p2699_p5, %p2659_p13  ;;  %p2708_p1 = por %p2707_p0, %p2706_p12 }
  0x46   : > { %p2702_p9 = pneg %p2701_p7 }
  0x48   : > { %p2709_p2 = pnand %p2708_p1, %p2702_p9 }
  0x4a   : > { %2712 = shalt.err (!%p2709_p2)
}
  0x4b   : > { %2497 = dma.hbm_to_vmem [thread:$0]  (!%p2988_p11), %s3498_s3, 512, %s2992_s30, [#allocation9], %s3485_s13, %s3485_s13, %s2872_s14  }
  0x4c   : > { %s36_s28 = sadd.s32 1, %s2863_s19  ;;  %s45_s22 = sadd.s32 1, %s2855_s17 }
  0x4d   : > { %p38_p13 = scmp.ge.s32.totalorder %s36_s28, 2  ;;  %p52_p6 = scmp.ne.s32.totalorder %s2855_s17, %s2851_s16 }
  0x4e   : > { %p53_p10 = scmp.eq.s32.totalorder %s2867_s20, 0  ;;  %p2511_p3 = scmp.lt.s32.totalorder %s2867_s20, 2 }
  0x4f   : > { %s3522_s28 = smov (%p38_p13, %s36_s28), 0  ;;  %p3500_p7 = scmp.eq.s32.totalorder %s2958_s21, 1 }
  0x50   : > { %3499 = sst [smem:[#allocation16_spill]] %s3522_s28  ;;  %p54_p5 = por %p53_p10, %p52_p6 }
  0x51   : > { %p3062_p9 = por %p3500_p7, %p52_p6  ;;  %s40_s29 = ssub.s32 %s2863_s19, %s3522_s28 }
  0x52   : > { %s3069_s5 = sand.u32 1, %s2855_s17   ;;  %p43_p11 = scmp.eq.s32.totalorder %s40_s29, 0 }
  0x53   : > { %s3501_s26 = scalar_select %p3062_p9, 1, 0 }
  0x54   : > { %s2241_s30 = sshll.u32 %s3069_s5, 4  ;;  %s2300_s6 = sshll.u32 %s2863_s19, 8 }
  0x55   : > { %s3074_s7 = scalar_select %p43_p11, %s2855_s17, %s45_s22  }
  0x56   : > { %s3502_s0 = sld [smem:[#allocation17_spill]]  ;;  %s208_s27 = scalar_lea.vmem [#allocation2], %s2241_s30 }
  0x57   : > { %s217_s11 = sshll.u32 %s208_s27, 4  ;;  %p3083_p12 = pnand %p2511_p3, %p54_p5  ;;  %s3087_s11 = int_to_ptr.vmem [resolvable:$true] %s217_s11 }
  0x58   : > { %s205_s29 = scalar_lea.sflag [#allocation3], %s3069_s5 }
  0x59   : > { %p2715_p1 = pneg %p3083_p12 }
  0x5c   : > { %s3079_s10 = scalar_lea.hbm %s3502_s0, %s2300_s6  ;;  %s2718_s9 = scalar_lea.hbm %s3502_s0, 512 }
  0x5d   : > { %s2713_s8 = scalar_lea.hbm %s3079_s10, 256  ;;  %p2719_p6 = scmp.lt.u32.totalorder %s3079_s10, %s3502_s0 }
  0x5e   : > { %p2714_p0 = scmp.ne.s32.totalorder %s3079_s10, %s2713_s8  ;;  %p2720_p10 = scmp.lt.u32.totalorder %s2718_s9, %s2713_s8 }
  0x5f   : > { %p2722_p5 = scmp.lt.u32.totalorder %s2713_s8, %s3079_s10 }
  0x60   : > { %p2716_p2 = pnand %p2715_p1, %p2714_p0  ;;  %p2721_p3 = por %p2720_p10, %p2719_p6 }
  0x62   : > { %p2717_p13 = pneg %p2716_p2  ;;  %p2723_p7 = por %p2722_p5, %p2721_p3 }
  0x64   : > { %p2724_p11 = pnand %p2723_p7, %p2717_p13 }
  0x66   : > { %2727 = shalt.err (!%p2724_p11)
}
  0x67   : > { %s2728_s22 = scalar_lea.vmem %s3087_s11, 256  ;;  %s2873_s30 = smov [#allocation2]  }
  0x68   : > { %p2729_p0 = scmp.ne.s32.totalorder %s3087_s11, %s2728_s22  ;;  %s2733_s6 = sshll.u32 %s2873_s30, 4  ;;  %s2734_s6 = int_to_ptr.vmem [resolvable:$false] %s2733_s6 }
  0x69   : > { %s2735_s13 = scalar_lea.vmem %s2734_s6, 512  ;;  %p2736_p4 = scmp.lt.s32.totalorder %s3087_s11, %s2734_s6 }
  0x6a   : > { %p2731_p2 = pnand %p2729_p0, %p2715_p1  ;;  %p2737_p6 = scmp.lt.s32.totalorder %s2735_s13, %s2728_s22 }
  0x6c   : > { %p2732_p9 = pneg %p2731_p2  ;;  %p2738_p10 = por %p2737_p6, %p2736_p4 }
  0x6e   : > { %p2739_p3 = pnand %p2738_p10, %p2732_p9 }
  0x70   : > { %2742 = shalt.err (!%p2739_p3)
}
  0x71   : > { %s3504_s8 = smov 128   ;;  %s2244_s9 = sshll.u32 %s3069_s5, 3 }
  0x72   : > { %2501 = dma.hbm_to_vmem [thread:$0]  (!%p3083_p12), %s3079_s10, 256, %s3087_s11, %s205_s29, %s3504_s8, %s3504_s8, %s2872_s14  }
  0x73   : > { %s2245_s27 = sshll.u32 %s2863_s19, 7  ;;  %s231_s13 = scalar_lea.vmem [#allocation5], %s2244_s9 }
  0x74   : > { %s3126_s6 = scalar_lea.hbm %s3480_s1, %s2245_s27  ;;  %s238_s0 = sshll.u32 %s231_s13, 4  ;;  %s239_s0 = int_to_ptr.vmem [resolvable:$true] %s238_s0 }
  0x75   : > { %s3505_s2 = sand.u32 1, %s2867_s20   ;;  %s2743_s28 = scalar_lea.hbm %s3126_s6, 128 }
  0x76   : > { %s228_s3 = scalar_lea.sflag [#allocation6], %s3505_s2  ;;  %p2744_p4 = scmp.ne.s32.totalorder %s3126_s6, %s2743_s28 }
  0x77   : > { %s2748_s10 = scalar_lea.hbm %s3480_s1, 256  ;;  %p2749_p5 = scmp.lt.u32.totalorder %s3126_s6, %s3480_s1 }
  0x78   : > { %p2746_p9 = pnand %p2744_p4, %p2715_p1  ;;  %p2750_p7 = scmp.lt.u32.totalorder %s2748_s10, %s2743_s28 }
  0x79   : > { %p2752_p0 = scmp.lt.u32.totalorder %s2743_s28, %s3126_s6 }
  0x7a   : > { %p2747_p13 = pneg %p2746_p9  ;;  %p2751_p11 = por %p2750_p7, %p2749_p5 }
  0x7c   : > { %p2753_p2 = por %p2752_p0, %p2751_p11 }
  0x7e   : > { %p2754_p6 = pnand %p2753_p2, %p2747_p13 }
  0x80   : > { %2757 = shalt.err (!%p2754_p6)
}
  0x81   : > { %s2758_s2 = scalar_lea.vmem %s239_s0, 128  ;;  %s2874_s8 = smov [#allocation5]  }
  0x82   : > { %p2759_p10 = scmp.ne.s32.totalorder %s239_s0, %s2758_s2  ;;  %s2763_s9 = sshll.u32 %s2874_s8, 4  ;;  %s2764_s9 = int_to_ptr.vmem [resolvable:$false] %s2763_s9 }
  0x83   : > { %s2765_s27 = scalar_lea.vmem %s2764_s9, 256  ;;  %p2766_p9 = scmp.lt.s32.totalorder %s239_s0, %s2764_s9 }
  0x84   : > { %p2761_p3 = pnand %p2759_p10, %p2715_p1  ;;  %p2767_p8 = scmp.lt.s32.totalorder %s2765_s27, %s2758_s2 }
  0x86   : > { %p2762_p4 = pneg %p2761_p3  ;;  %p2768_p5 = por %p2767_p8, %p2766_p9 }
  0x88   : > { %p2769_p7 = pnand %p2768_p5, %p2762_p4 }
  0x8a   : > { %2772 = shalt.err (!%p2769_p7)
}
  0x8b   : > { %2504 = dma.hbm_to_vmem [thread:$0]  (!%p3083_p12), %s3126_s6, 128, %s239_s0, %s228_s3  }
  0x8c   : > { %p3506_p13 = scmp.ne.s32.totalorder %s3495_s25, 0 }
  0x8d   : > { %s3152_s28 = sand.u32 (!%p3506_p13), 1, %s2851_s16   ;;  %p3507_p8 = scmp.ne.s32.totalorder (!%p3506_p13), %s3493_s23, 0 }
  0x8e   : > { %247 = sbr.rel (%p3506_p13) target bundleno = 1414 (0x586), region = 36  ;;  %s2247_s22 = sshll.u32 (!%p3506_p13), %s3152_s28, 4 }
  0x8f   : > { %s250_s30 = scalar_lea.sflag (!%p3506_p13), [#allocation3], %s3152_s28  ;;  %s3158_s13 = scalar_lea.vmem (!%p3506_p13), [#allocation2], %s2247_s22 }
  0x95   : > { %2826 = dma.done.wait (%p3507_p8), %s250_s30, 256  }
  0x96   : > { %2828 = vsyncadd (%p3507_p8), %s250_s30, 4294967040  ;;  %s258_s0 = sand.u32 1, %s2958_s21   ;;  %s2248_s3 = sshll.u32 %s3152_s28, 3 }
  0x97   : > { %s259_s25 = scalar_lea.sflag [#allocation6], %s258_s0  ;;  %s3166_s12 = scalar_lea.vmem [#allocation5], %s2248_s3 }
  0x98   : > { %2830 = dma.done.wait (%p3507_p8), %s259_s25, 128  }
  0x99   : > { %2832 = vsyncadd (%p3507_p8), %s259_s25, 4294967168  ;;  %p3508_p12 = scmp.eq.s32.totalorder %s2958_s21, 0 }
  0x9b   : > { %2834 = dma.done.wait (%p3508_p12), [#allocation6], 512   ;;  %p3509_p1 = pmov %p3508_p12 }
  0x9d   : > { %2836 = vsyncadd (%p3509_p1), [#allocation6], 4294966784  ;;  %p3510_p11 = pmov %p3509_p1 }
  0x9e   : > { %p3511_p0 = pmov %p3509_p1 }
  0x9f   : > { %2838 = dma.done.wait (%p3510_p11), [#allocation9], 512  }
  0xa0   : > { %2840 = vsyncadd (%p3511_p0), [#allocation9], 4294966784  ;;  %v2875_v0 = vmov 0.0|0.0   ;;  %vm2876_vm0 = vmmov 0   ;;  %v2877_v1 = vmov 0.0   ;;  %v305_v2 = vld [vmem:[#allocation7] sm:$0xff] }
  0xa1   : > { %2471 = vmatprep.subr.bf16.mxu1 %v2875_v0  ;;  %2380 = vmatprep.mubr.msk.f32.mxu1 %vm2876_vm0, %v2877_v1  ;;  %v306_v3 = vld [vmem:[#allocation7 + $0x8] sm:$0xff]  ;;  %v393_v4 = vld [vmem:[#allocation8] sm:$0xff]  ;;  %vm309_vm1 = vcmask 261120   ;;  %v307_v7 = vld [vmem:[#allocation7 + $0x10] sm:$0xff]  ;;  %vm470_vm2 = vcmask 31744   ;;  %s2878_s21 = smov 120  }
  0xa2   : > { %v2463_v5 = vpack.c.bf16 %v306_v3, %v305_v2  ;;  %v394_v6 = vld [vmem:[#allocation8 + $0x8] sm:$0xff]  ;;  %v308_v8 = vld [vmem:[#allocation7 + $0x18] sm:$0xff]  ;;  %v395_v11 = vld [vmem:[#allocation8 + $0x10] sm:$0xff]  ;;  %s2879_s23 = smov 124   ;;  %s2880_s6 = smov 112   ;;  %vm555_vm3 = vcmask 64512  }
  0xa3   : > { %v2472_v9 = vpack.c.bf16 %v394_v6, %v393_v4  ;;  %v2467_v10 = vpack.c.bf16 %v308_v8, %v307_v7  ;;  %v396_v12 = vld [vmem:[#allocation8 + $0x18] sm:$0xff]  ;;  %v302_v13 = vld [vmem:[%s3158_s13] sm:$0xff]  ;;  %s2881_s14 = smov 116   ;;  %s2882_s5 = smov 108   ;;  %vm2073_vm4 = vcmask 97280   ;;  %vm2076_vm5 = vcmask 130048  }
  0xa4   : > { %2464 = vmatprep.subr.bf16.mxu0 %v2463_v5  ;;  %2369 = vmatprep.mubr.msk.f32.mxu0 %vm309_vm1, %v302_v13  ;;  %v2475_v14 = vpack.c.bf16 %v396_v12, %v395_v11  ;;  %v304_v15 = vld [vmem:[%s3166_s12] sm:$0xff]  ;;  %v303_v16 = vld [vmem:[%s3158_s13 + $0x8] sm:$0xff]  ;;  %s2883_s10 = smov 104   ;;  %s2884_s11 = smov 100   ;;  %vm2079_vm6 = vcmask 162816   ;;  %vm2082_vm7 = vcmask 195584  }
  0xa5   : > { %2473 = vmatpush3.bf16.msra.mxu1 %v2472_v9  ;;  %2466 = vmatpush3.bf16.msra.mxu0 %v2463_v5  ;;  %s2885_s29 = smov 92   ;;  %s2886_s2 = smov 96   ;;  %vm2085_vm8 = vcmask 228352  }
  0xa6   : > { %2474 = vmatprep.subr.bf16.mxu1 %v2875_v0  ;;  %2468 = vmatprep.subr.bf16.mxu0 %v2467_v10  ;;  %s2887_s8 = smov 80   ;;  %s2888_s9 = smov 88  }
  0xa7   : > { %s2889_s27 = smov 84   ;;  %s2890_s30 = smov 76  }
  0xa8   : > { %s2891_s13 = smov 68   ;;  %s2892_s0 = smov 72  }
  0xa9   : > { %2476 = vmatpush3.bf16.msra.mxu1 %v2475_v14  ;;  %2470 = vmatpush3.bf16.msra.mxu0 %v2467_v10  ;;  %s2893_s3 = smov 4   ;;  %s2894_s25 = smov 8  }
  0xaa   : > { %s2895_s12 = smov 12   ;;  %p3512_p6 = scmp.ne.s32.totalorder %s3501_s26, 0 }
  0xac   : > { %2381 = vmatmul.mubr.msk.f32.vlgmr.msra.gmra.mrb[0].mxu1 %vm309_vm1, %v304_v15  ;;  %2370 = vmatmul.mubr.msk.f32.vlgmr.msra.gmra.mrb[0].mxu0 %vm309_vm1, %v303_v16 }
 0x17f   : > { %v3186_v17 = vpop.f32.mrb[0].mxu1  ;;  %v2371_v18 = vpop.f32.mrb[0].mxu0 }
 0x180   : > { %859 = vrot.lane.b32.xlu1 %v3186_v17, %s2878_s21  ;;  %666 = vrot.lane.b32.xlu0 %v3186_v17, %s2879_s23  ;;  %v2382_v19 = vpop.f32.mrb[1].mxu1  ;;  %v382_v20 = vpop.f32.mrb[1].mxu0  ;;  %v392_v21 = vmul.f32 0.17677669, %v2371_v18 }
 0x181   : > { %2383 = vmatprep.subr.msk.mxu0 %vm470_vm2, %v3186_v17  ;;  %v391_v22 = vmul.f32 0.17677669, %v382_v20 }
 0x182   : > { %2384 = vmatpush3.xpose.msk.msra.mxu0 %vm470_vm2, %v3186_v17 }
 0x183   : > { %2385 = vmatprep.mubr.msk.f32.mxu0 %vm470_vm2, %v391_v22 }
 0x184   : > { %1245 = vrot.lane.b32.xlu1 %v3186_v17, %s2880_s6  ;;  %1052 = vrot.lane.b32.xlu0 %v3186_v17, %s2881_s14 }
 0x185   : > { %2386 = vmatmul.mubr.msk.f32.vlgmr.msra.gmra.mrb[2].mxu0 %vm470_vm2, %v392_v21 }
 0x188   : > { %1050 = vrot.lane.b32.xlu0 %v392_v21, %s2881_s14  ;;  %664 = vrot.lane.b32.xlu1 %v392_v21, %s2879_s23 }
 0x18c   : > { %857 = vrot.lane.b32.xlu1 %v392_v21, %s2878_s21  ;;  %662 = vrot.lane.b32.xlu0 %v391_v22, %s2879_s23  ;;  %s2897_s23 = smov 20  }
 0x190   : > { %1243 = vrot.lane.b32.xlu1 %v392_v21, %s2880_s6  ;;  %855 = vrot.lane.b32.xlu0 %v391_v22, %s2878_s21  ;;  %s2896_s21 = smov 16  }
 0x194   : > { %1048 = vrot.lane.b32.xlu1 %v391_v22, %s2881_s14  ;;  %1438 = vrot.lane.b32.xlu0 %v3186_v17, %s2882_s5  ;;  %s2899_s14 = smov 28  }
 0x198   : > { %1631 = vrot.lane.b32.xlu1 %v3186_v17, %s2883_s10  ;;  %1241 = vrot.lane.b32.xlu0 %v391_v22, %s2880_s6  ;;  %s2898_s6 = smov 24  }
 0x19c   : > { %1434 = vrot.lane.b32.xlu1 %v391_v22, %s2882_s5  ;;  %1436 = vrot.lane.b32.xlu0 %v392_v21, %s2882_s5  ;;  %s299_s5 = scalar_lea.vmem [#allocation10], %s2247_s22 }
 0x1a0   : > { %1629 = vrot.lane.b32.xlu1 %v392_v21, %s2883_s10  ;;  %1627 = vrot.lane.b32.xlu0 %v391_v22, %s2883_s10  ;;  %s2106_s10 = sshll.u32 %s299_s5, 4  ;;  %s3422_s10 = int_to_ptr.vmem [resolvable:$true] %s2106_s10 }
 0x1a4   : > { %1820 = vrot.lane.b32.xlu1 %v391_v22, %s2884_s11  ;;  %1824 = vrot.lane.b32.xlu0 %v3186_v17, %s2884_s11 }
 0x1a8   : > { %771 = vrot.lane.b32.xlu1 %v3186_v17, %s2885_s29  ;;  %1822 = vrot.lane.b32.xlu0 %v392_v21, %s2884_s11  ;;  %s2301_s11 = sshll.u32 %s2859_s18, 8  ;;  %s2091_s18 = scalar_lea.sflag [#allocation4], %s3152_s28 }
 0x1ac   : > { %578 = vrot.lane.b32.xlu0 %v3186_v17, %s2886_s2  ;;  %s3427_s2 = scalar_lea.hbm %s3483_s4, %s2301_s11 }
 0x1f2   : > { %v860_v23 = vpop.permute.xlu1 %859  ;;  %v667_v24 = vpop.permute.xlu0 %666 }
 0x1f3   : > { %2393 = vmatprep.subr.msk.mxu0 %vm470_vm2, %v667_v24 }
 0x1f4   : > { %2394 = vmatpush3.xpose.msk.msra.mxu0 %vm470_vm2, %v667_v24 }
 0x1f5   : > { %2403 = vmatprep.subr.msk.mxu0 %vm470_vm2, %v860_v23 }
 0x1f6   : > { %v1246_v25 = vpop.permute.xlu1 %1245  ;;  %v1053_v26 = vpop.permute.xlu0 %1052 }
 0x1fa   : > { %v1051_v27 = vpop.permute.xlu0 %1050  ;;  %v665_v28 = vpop.permute.xlu1 %664 }
 0x1fe   : > { %v858_v29 = vpop.permute.xlu1 %857  ;;  %v663_v30 = vpop.permute.xlu0 %662 }
 0x1ff   : > { %2395 = vmatprep.mubr.msk.f32.mxu0 %vm470_vm2, %v663_v30 }
 0x200   : > { %2396 = vmatmul.mubr.msk.f32.vlgmr.msra.gmra.mrb[4].mxu0 %vm470_vm2, %v665_v28 }
 0x201   : > { %2404 = vmatpush3.xpose.msk.msra.mxu0 %vm470_vm2, %v860_v23 }
 0x202   : > { %2413 = vmatprep.subr.msk.mxu0 %vm470_vm2, %v1053_v26  ;;  %v1244_v31 = vpop.permute.xlu1 %1243  ;;  %v856_v32 = vpop.permute.xlu0 %855 }
 0x203   : > { %2405 = vmatprep.mubr.msk.f32.mxu0 %vm470_vm2, %v856_v32 }
 0x204   : > { %2406 = vmatmul.mubr.msk.f32.vlgmr.msra.gmra.mrb[6].mxu0 %vm470_vm2, %v858_v29 }
 0x205   : > { %2414 = vmatpush3.xpose.msk.msra.mxu0 %vm470_vm2, %v1053_v26 }
 0x206   : > { %2423 = vmatprep.subr.msk.mxu0 %vm470_vm2, %v1246_v25  ;;  %v1049_v33 = vpop.permute.xlu1 %1048  ;;  %v1439_v34 = vpop.permute.xlu0 %1438 }
 0x207   : > { %2415 = vmatprep.mubr.msk.f32.mxu0 %vm470_vm2, %v1049_v33 }
 0x208   : > { %2416 = vmatmul.mubr.msk.f32.vlgmr.msra.gmra.mrb[8].mxu0 %vm470_vm2, %v1051_v27 }
 0x209   : > { %2424 = vmatpush3.xpose.msk.msra.mxu0 %vm470_vm2, %v1246_v25 }
 0x20a   : > { %2433 = vmatprep.subr.msk.mxu0 %vm470_vm2, %v1439_v34  ;;  %v1632_v35 = vpop.permute.xlu1 %1631  ;;  %v1242_v36 = vpop.permute.xlu0 %1241 }
 0x20b   : > { %2425 = vmatprep.mubr.msk.f32.mxu0 %vm470_vm2, %v1242_v36 }
 0x20c   : > { %2426 = vmatmul.mubr.msk.f32.vlgmr.msra.gmra.mrb[10].mxu0 %vm470_vm2, %v1244_v31 }
 0x20d   : > { %2434 = vmatpush3.xpose.msk.msra.mxu0 %vm470_vm2, %v1439_v34 }
 0x20e   : > { %2443 = vmatprep.subr.msk.mxu0 %vm470_vm2, %v1632_v35  ;;  %v1435_v37 = vpop.permute.xlu1 %1434  ;;  %v1437_v38 = vpop.permute.xlu0 %1436 }
 0x20f   : > { %2435 = vmatprep.mubr.msk.f32.mxu0 %vm470_vm2, %v1435_v37 }
 0x210   : > { %2436 = vmatmul.mubr.msk.f32.vlgmr.msra.gmra.mrb[12].mxu0 %vm470_vm2, %v1437_v38 }
 0x211   : > { %2444 = vmatpush3.xpose.msk.msra.mxu0 %vm470_vm2, %v1632_v35 }
 0x212   : > { %v1630_v39 = vpop.permute.xlu1 %1629  ;;  %v1628_v40 = vpop.permute.xlu0 %1627 }
 0x213   : > { %2445 = vmatprep.mubr.msk.f32.mxu0 %vm470_vm2, %v1628_v40 }
 0x214   : > { %2446 = vmatmul.mubr.msk.f32.vlgmr.msra.gmra.mrb[14].mxu0 %vm470_vm2, %v1630_v39 }
 0x216   : > { %v1821_v41 = vpop.permute.xlu1 %1820  ;;  %v1825_v42 = vpop.permute.xlu0 %1824 }
 0x217   : > { %2453 = vmatprep.subr.msk.mxu0 %vm470_vm2, %v1825_v42  ;;  %2455 = vmatprep.mubr.msk.f32.mxu0 %vm470_vm2, %v1821_v41 }
 0x218   : > { %2454 = vmatpush3.xpose.msk.msra.mxu0 %vm470_vm2, %v1825_v42 }
 0x21a   : > { %v1823_v43 = vpop.permute.xlu0 %1822  ;;  %v3231_v45 = vpop.permute.xlu1 %771 }
 0x21b   : > { %2456 = vmatmul.mubr.msk.f32.vlgmr.msra.gmra.mrb[16].mxu0 %vm470_vm2, %v1823_v43 }
 0x21e   : > { %v579_v44 = vpop.permute.xlu0 %578 }
 0x21f   : > { %2388 = vmatprep.subr.mxu1 %v579_v44 }
 0x220   : > { %2389 = vmatpush3.msra.mxu1 %v579_v44 }
 0x221   : > { %2398 = vmatprep.subr.mxu1 %v3231_v45 }
 0x258   : > { %v2387_v46 = vpop.f32.mrb[2].mxu0 }
 0x259   : > { %v546_v47 = vpop.f32.mrb[3].mxu0  ;;  %v559_v48 = vsel %vm555_vm3, %v2387_v46, -inf }
 0x25a   : > { %560 = vmax.xlane.f32.xlu0 %v559_v48  ;;  %v556_v49 = vsel %vm555_vm3, %v546_v47, -inf }
 0x25b   : > { %557 = vmax.xlane.f32.xlu1 %v556_v49 }
 0x2d3   : > { %v3236_v50 = vpop.f32.mrb[4].mxu0 }
 0x2d4   : > { %v3238_v51 = vpop.f32.mrb[5].mxu0  ;;  %v752_v52 = vsel %vm555_vm3, %v3236_v50, -inf }
 0x2d5   : > { %753 = vmax.xlane.f32.xlu1 %v752_v52  ;;  %v749_v53 = vsel %vm555_vm3, %v3238_v51, -inf }
 0x2d6   : > { %750 = vmax.xlane.f32.xlu0 %v749_v53 }
 0x2d7   : > { %v3244_v54 = vpop.f32.mrb[6].mxu0 }
 0x2d8   : > { %v3246_v55 = vpop.f32.mrb[7].mxu0  ;;  %v945_v56 = vsel %vm555_vm3, %v3244_v54, -inf }
 0x2d9   : > { %946 = vmax.xlane.f32.xlu1 %v945_v56  ;;  %v942_v57 = vsel %vm555_vm3, %v3246_v55, -inf }
 0x2da   : > { %943 = vmax.xlane.f32.xlu0 %v942_v57 }
 0x2db   : > { %v3252_v58 = vpop.f32.mrb[8].mxu0 }
 0x2dc   : > { %v3254_v59 = vpop.f32.mrb[9].mxu0  ;;  %v1138_v60 = vsel %vm555_vm3, %v3252_v58, -inf }
 0x2dd   : > { %1139 = vmax.xlane.f32.xlu1 %v1138_v60  ;;  %v1135_v61 = vsel %vm555_vm3, %v3254_v59, -inf }
 0x2de   : > { %1136 = vmax.xlane.f32.xlu0 %v1135_v61 }
 0x2df   : > { %v3260_v62 = vpop.f32.mrb[10].mxu0 }
 0x2e0   : > { %v3262_v63 = vpop.f32.mrb[11].mxu0  ;;  %v1331_v0 = vsel %vm555_vm3, %v3260_v62, -inf }
 0x2e1   : > { %1332 = vmax.xlane.f32.xlu1 %v1331_v0  ;;  %v1328_v1 = vsel %vm555_vm3, %v3262_v63, -inf }
 0x2e2   : > { %1329 = vmax.xlane.f32.xlu0 %v1328_v1 }
 0x2e3   : > { %v3268_v2 = vpop.f32.mrb[12].mxu0 }
 0x2e4   : > { %v3270_v3 = vpop.f32.mrb[13].mxu0  ;;  %v1524_v4 = vsel %vm555_vm3, %v3268_v2, -inf }
 0x2e5   : > { %1525 = vmax.xlane.f32.xlu1 %v1524_v4  ;;  %v1521_v5 = vsel %vm555_vm3, %v3270_v3, -inf }
 0x2e6   : > { %1522 = vmax.xlane.f32.xlu0 %v1521_v5 }
 0x2e7   : > { %v3276_v6 = vpop.f32.mrb[14].mxu0  ;;  %v561_v14 = vpop.xlane.xlu0 %560 }
 0x2e8   : > { %v3278_v7 = vpop.f32.mrb[15].mxu0  ;;  %v1717_v8 = vsel %vm555_vm3, %v3276_v6, -inf  ;;  %v563_v15 = vsub.f32 %v2387_v46, %v561_v14  ;;  %v558_v18 = vpop.xlane.xlu1 %557 }
 0x2e9   : > { %1718 = vmax.xlane.f32.xlu1 %v1717_v8  ;;  %v1714_v9 = vsel %vm555_vm3, %v3278_v7, -inf  ;;  %v562_v19 = vsub.f32 %v546_v47, %v558_v18 }
 0x2ea   : > { %1715 = vmax.xlane.f32.xlu0 %v1714_v9  ;;  %v566_v16 = vmul.f32 1.442695, %v563_v15 }
 0x2eb   : > { %v564_v20 = vmul.f32 1.442695, %v562_v19 }
 0x2ec   : > { %2593 = vpow2.f32 %v566_v16 }
 0x2ed   : > { %2595 = vpow2.f32 %v564_v20 }
 0x2ee   : > { %v3284_v10 = vpop.f32.mrb[16].mxu0 }
 0x2ef   : > { %v3286_v11 = vpop.f32.mrb[17].mxu0  ;;  %v1910_v12 = vsel %vm555_vm3, %v3284_v10, -inf }
 0x2f0   : > { %1911 = vmax.xlane.f32.xlu1 %v1910_v12  ;;  %v1907_v13 = vsel %vm555_vm3, %v3286_v11, -inf }
 0x2f1   : > { %1908 = vmax.xlane.f32.xlu0 %v1907_v13 }
 0x2f6   : > { %v3296_v21 = vpop.eup %2593 }
 0x2f7   : > { %v571_v22 = vsel %vm555_vm3, %v3296_v21, 0.0  ;;  %v3300_v23 = vpop.eup %2595 }
 0x2f8   : > { %v568_v24 = vsel %vm555_vm3, %v3300_v23, 0.0 }
 0x301   : > { %1350 = vrot.lane.b32.xlu1 %v3186_v17, %s2887_s8  ;;  %s2773_s8 = scalar_lea.vmem %s3422_s10, 256 }
 0x302   : > { %p2774_p2 = scmp.ne.s32.totalorder %s3422_s10, %s2773_s8 }
 0x304   : > { %p2775_p10 = pnand %p2774_p2, %p3512_p6 }
 0x306   : > { %p2776_p3 = pneg %p2775_p10 }
 0x307   : > { %964 = vrot.lane.b32.xlu0 %v3186_v17, %s2888_s9  ;;  %s2900_s9 = smov [#allocation10]  }
 0x30b   : > { %1157 = vrot.lane.b32.xlu0 %v3186_v17, %s2889_s27  ;;  %s2777_s27 = sshll.u32 %s2900_s9, 4  ;;  %s2778_s27 = int_to_ptr.vmem [resolvable:$false] %s2777_s27 }
 0x30c   : > { %p2780_p4 = scmp.lt.s32.totalorder %s3422_s10, %s2778_s27 }
 0x30f   : > { %1543 = vrot.lane.b32.xlu0 %v3186_v17, %s2890_s30  ;;  %s2779_s30 = scalar_lea.vmem %s2778_s27, 512 }
 0x310   : > { %p2781_p9 = scmp.lt.s32.totalorder %s2779_s30, %s2773_s8 }
 0x312   : > { %p2782_p5 = por %p2781_p9, %p2780_p4 }
 0x314   : > { %p2783_p7 = pnand %p2782_p5, %p2776_p3 }
 0x325   : > { %572 = vadd.xlane.f32.xlu1 %v571_v22 }
 0x32e   : > { %569 = vadd.xlane.f32.xlu0 %v568_v24 }
 0x362   : > { %v754_v25 = vpop.xlane.xlu1 %753 }
 0x363   : > { %v756_v26 = vsub.f32 %v3236_v50, %v754_v25  ;;  %v751_v27 = vpop.xlane.xlu0 %750 }
 0x364   : > { %v755_v28 = vsub.f32 %v3238_v51, %v751_v27 }
 0x365   : > { %v759_v29 = vmul.f32 1.442695, %v756_v26 }
 0x366   : > { %v757_v30 = vmul.f32 1.442695, %v755_v28  ;;  %v947_v31 = vpop.xlane.xlu1 %946 }
 0x367   : > { %2597 = vpow2.f32 %v759_v29  ;;  %v949_v32 = vsub.f32 %v3244_v54, %v947_v31  ;;  %v944_v33 = vpop.xlane.xlu0 %943 }
 0x368   : > { %2599 = vpow2.f32 %v757_v30  ;;  %v948_v34 = vsub.f32 %v3246_v55, %v944_v33 }
 0x369   : > { %v952_v35 = vmul.f32 1.442695, %v949_v32 }
 0x36a   : > { %v950_v36 = vmul.f32 1.442695, %v948_v34  ;;  %v1140_v37 = vpop.xlane.xlu1 %1139 }
 0x36b   : > { %2601 = vpow2.f32 %v952_v35  ;;  %v1142_v38 = vsub.f32 %v3252_v58, %v1140_v37  ;;  %v1137_v39 = vpop.xlane.xlu0 %1136 }
 0x36c   : > { %2603 = vpow2.f32 %v950_v36  ;;  %v1141_v40 = vsub.f32 %v3254_v59, %v1137_v39 }
 0x36d   : > { %v1145_v41 = vmul.f32 1.442695, %v1142_v38 }
 0x36e   : > { %v1143_v42 = vmul.f32 1.442695, %v1141_v40  ;;  %v1333_v43 = vpop.xlane.xlu1 %1332 }
 0x36f   : > { %2605 = vpow2.f32 %v1145_v41  ;;  %v1335_v44 = vsub.f32 %v3260_v62, %v1333_v43  ;;  %v1330_v46 = vpop.xlane.xlu0 %1329 }
 0x370   : > { %2607 = vpow2.f32 %v1143_v42  ;;  %v1334_v47 = vsub.f32 %v3262_v63, %v1330_v46 }
 0x371   : > { %v3312_v48 = vpop.eup %2597  ;;  %v1338_v49 = vmul.f32 1.442695, %v1335_v44 }
 0x372   : > { %v3314_v50 = vpop.eup %2599  ;;  %v1336_v51 = vmul.f32 1.442695, %v1334_v47  ;;  %v1526_v52 = vpop.xlane.xlu1 %1525  ;;  %v764_v53 = vsel %vm555_vm3, %v3312_v48, 0.0 }
 0x373   : > { %2609 = vpow2.f32 %v1338_v49  ;;  %v1528_v54 = vsub.f32 %v3268_v2, %v1526_v52  ;;  %v1523_v55 = vpop.xlane.xlu0 %1522  ;;  %765 = vadd.xlane.f32.xlu1 %v764_v53  ;;  %v761_v56 = vsel %vm555_vm3, %v3314_v50, 0.0 }
 0x374   : > { %2611 = vpow2.f32 %v1336_v51  ;;  %v1527_v57 = vsub.f32 %v3270_v3, %v1523_v55  ;;  %762 = vadd.xlane.f32.xlu0 %v761_v56 }
 0x375   : > { %v3322_v58 = vpop.eup %2601  ;;  %v1531_v59 = vmul.f32 1.442695, %v1528_v54 }
 0x376   : > { %v3324_v60 = vpop.eup %2603  ;;  %v1529_v61 = vmul.f32 1.442695, %v1527_v57  ;;  %v1719_v62 = vpop.xlane.xlu1 %1718  ;;  %v957_v63 = vsel %vm555_vm3, %v3322_v58, 0.0 }
 0x377   : > { %2613 = vpow2.f32 %v1531_v59  ;;  %v1721_v0 = vsub.f32 %v3276_v6, %v1719_v62  ;;  %v1716_v1 = vpop.xlane.xlu0 %1715  ;;  %958 = vadd.xlane.f32.xlu1 %v957_v63  ;;  %v954_v2 = vsel %vm555_vm3, %v3324_v60, 0.0 }
 0x378   : > { %2615 = vpow2.f32 %v1529_v61  ;;  %v1720_v3 = vsub.f32 %v3278_v7, %v1716_v1  ;;  %955 = vadd.xlane.f32.xlu0 %v954_v2 }
 0x379   : > { %v3332_v4 = vpop.eup %2605  ;;  %v1724_v5 = vmul.f32 1.442695, %v1721_v0 }
 0x37a   : > { %v3334_v8 = vpop.eup %2607  ;;  %v1722_v9 = vmul.f32 1.442695, %v1720_v3  ;;  %v1150_v12 = vsel %vm555_vm3, %v3332_v4, 0.0 }
 0x37b   : > { %2617 = vpow2.f32 %v1724_v5  ;;  %1151 = vadd.xlane.f32.xlu1 %v1150_v12  ;;  %v1147_v6 = vsel %vm555_vm3, %v3334_v8, 0.0 }
 0x37c   : > { %2619 = vpow2.f32 %v1722_v9  ;;  %1148 = vadd.xlane.f32.xlu0 %v1147_v6 }
 0x37d   : > { %v3340_v13 = vpop.eup %2609  ;;  %v1912_v7 = vpop.xlane.xlu1 %1911 }
 0x37e   : > { %v3342_v14 = vpop.eup %2611  ;;  %v1914_v15 = vsub.f32 %v3284_v10, %v1912_v7  ;;  %v1909_v16 = vpop.xlane.xlu0 %1908  ;;  %v1343_v18 = vsel %vm555_vm3, %v3340_v13, 0.0 }
 0x37f   : > { %v1913_v19 = vsub.f32 %v3286_v11, %v1909_v16  ;;  %1344 = vadd.xlane.f32.xlu1 %v1343_v18  ;;  %v1340_v20 = vsel %vm555_vm3, %v3342_v14, 0.0 }
 0x380   : > { %v1917_v22 = vmul.f32 1.442695, %v1914_v15  ;;  %1341 = vadd.xlane.f32.xlu0 %v1340_v20 }
 0x381   : > { %v3350_v24 = vpop.eup %2613  ;;  %v1915_v25 = vmul.f32 1.442695, %v1913_v19  ;;  %v1351_v37 = vpop.permute.xlu1 %1350 }
 0x382   : > { %v3352_v26 = vpop.eup %2615  ;;  %2621 = vpow2.f32 %v1917_v22  ;;  %v1536_v10 = vsel %vm555_vm3, %v3350_v24, 0.0  ;;  %v965_v35 = vpop.permute.xlu0 %964 }
 0x383   : > { %1537 = vadd.xlane.f32.xlu1 %v1536_v10  ;;  %v1533_v27 = vsel %vm555_vm3, %v3352_v26, 0.0  ;;  %2623 = vpow2.f32 %v1915_v25 }
 0x384   : > { %1534 = vadd.xlane.f32.xlu0 %v1533_v27 }
 0x385   : > { %v3358_v11 = vpop.eup %2617 }
 0x386   : > { %v3360_v28 = vpop.eup %2619  ;;  %v1729_v29 = vsel %vm555_vm3, %v3358_v11, 0.0  ;;  %v1158_v36 = vpop.permute.xlu0 %1157 }
 0x387   : > { %1730 = vadd.xlane.f32.xlu1 %v1729_v29  ;;  %v1726_v30 = vsel %vm555_vm3, %v3360_v28, 0.0 }
 0x388   : > { %1727 = vadd.xlane.f32.xlu0 %v1726_v30 }
 0x38a   : > { %v3376_v38 = vpop.permute.xlu0 %1543 }
 0x38c   : > { %v3366_v31 = vpop.eup %2621 }
 0x38d   : > { %v1922_v32 = vsel %vm555_vm3, %v3366_v31, 0.0  ;;  %v3370_v33 = vpop.eup %2623 }
 0x38e   : > { %1923 = vadd.xlane.f32.xlu1 %v1922_v32  ;;  %v1919_v34 = vsel %vm555_vm3, %v3370_v33, 0.0 }
 0x392   : > { %1920 = vadd.xlane.f32.xlu1 %v1919_v34 }
 0x39e   : > { %1929 = vrot.lane.b32.xlu0 %v3186_v17, %s2891_s13 }
 0x3a3   : > { %1736 = vrot.lane.b32.xlu1 %v3186_v17, %s2892_s0 }
 0x3b2   : > { %v573_v39 = vpop.xlane.xlu1 %572 }
 0x3b3   : > { %2625 = vrcp.f32 %v573_v39 }
 0x3bb   : > { %v570_v40 = vpop.xlane.xlu0 %569 }
 0x3bc   : > { %2627 = vrcp.f32 %v570_v40 }
 0x3bd   : > { %v2626_v41 = vpop.eup %2625 }
 0x3be   : > { %v577_v44 = vmul.f32 %v2626_v41, %v3296_v21 }
 0x3c6   : > { %v2628_v42 = vpop.eup %2627 }
 0x3c7   : > { %v576_v43 = vmul.f32 %v2628_v42, %v3300_v23 }
 0x3c9   : > { %2390 = vmatprep.mubr.msk.f32.mxu1 %vm555_vm3, %v576_v43 }
 0x3ca   : > { %2391 = vmatmul.mubr.msk.f32.vlgmr.msra.gmra.mrb[2].mxu1 %vm555_vm3, %v577_v44 }
 0x3cb   : > { %2399 = vmatpush3.msra.mxu1 %v3231_v45 }
 0x3cc   : > { %2408 = vmatprep.subr.mxu1 %v965_v35 }
 0x400   : > { %v766_v17 = vpop.xlane.xlu1 %765 }
 0x401   : > { %2629 = vrcp.f32 %v766_v17  ;;  %v763_v46 = vpop.xlane.xlu0 %762 }
 0x402   : > { %2631 = vrcp.f32 %v763_v46 }
 0x404   : > { %v959_v47 = vpop.xlane.xlu1 %958 }
 0x405   : > { %2633 = vrcp.f32 %v959_v47  ;;  %v956_v49 = vpop.xlane.xlu0 %955 }
 0x406   : > { %2635 = vrcp.f32 %v956_v49 }
 0x408   : > { %v1152_v51 = vpop.xlane.xlu1 %1151 }
 0x409   : > { %2637 = vrcp.f32 %v1152_v51  ;;  %v1149_v23 = vpop.xlane.xlu0 %1148 }
 0x40a   : > { %2639 = vrcp.f32 %v1149_v23 }
 0x40b   : > { %v2630_v21 = vpop.eup %2629 }
 0x40c   : > { %v2632_v52 = vpop.eup %2631  ;;  %v1345_v53 = vpop.xlane.xlu1 %1344  ;;  %v770_v55 = vmul.f32 %v2630_v21, %v3312_v48 }
 0x40d   : > { %2641 = vrcp.f32 %v1345_v53  ;;  %v1342_v54 = vpop.xlane.xlu0 %1341  ;;  %v769_v45 = vmul.f32 %v2632_v52, %v3314_v50 }
 0x40e   : > { %2643 = vrcp.f32 %v1342_v54 }
 0x40f   : > { %v2634_v56 = vpop.eup %2633  ;;  %2400 = vmatprep.mubr.msk.f32.mxu1 %vm555_vm3, %v769_v45 }
 0x410   : > { %v2636_v57 = vpop.eup %2635  ;;  %2401 = vmatmul.mubr.msk.f32.vlgmr.msra.gmra.mrb[4].mxu1 %vm555_vm3, %v770_v55  ;;  %v1538_v59 = vpop.xlane.xlu1 %1537  ;;  %v963_v63 = vmul.f32 %v2634_v56, %v3322_v58 }
 0x411   : > { %2409 = vmatpush3.msra.mxu1 %v965_v35  ;;  %2645 = vrcp.f32 %v1538_v59  ;;  %v1535_v61 = vpop.xlane.xlu0 %1534  ;;  %v962_v62 = vmul.f32 %v2636_v57, %v3324_v60 }
 0x412   : > { %2647 = vrcp.f32 %v1535_v61  ;;  %2418 = vmatprep.subr.mxu1 %v1158_v36 }
 0x413   : > { %v2638_v50 = vpop.eup %2637  ;;  %2410 = vmatprep.mubr.msk.f32.mxu1 %vm555_vm3, %v962_v62 }
 0x414   : > { %v2640_v48 = vpop.eup %2639  ;;  %2411 = vmatmul.mubr.msk.f32.vlgmr.msra.gmra.mrb[6].mxu1 %vm555_vm3, %v963_v63  ;;  %v1731_v0 = vpop.xlane.xlu1 %1730  ;;  %v1156_v3 = vmul.f32 %v2638_v50, %v3332_v4 }
 0x415   : > { %2419 = vmatpush3.msra.mxu1 %v1158_v36  ;;  %v1728_v1 = vpop.xlane.xlu0 %1727  ;;  %v1155_v2 = vmul.f32 %v2640_v48, %v3334_v8 }
 0x416   : > { %2649 = vrcp.f32 %v1728_v1  ;;  %2428 = vmatprep.subr.mxu1 %v1351_v37 }
 0x417   : > { %v2642_v60 = vpop.eup %2641  ;;  %2651 = vrcp.f32 %v1731_v0  ;;  %2420 = vmatprep.mubr.msk.f32.mxu1 %vm555_vm3, %v1155_v2 }
 0x418   : > { %v2644_v58 = vpop.eup %2643  ;;  %2421 = vmatmul.mubr.msk.f32.vlgmr.msra.gmra.mrb[8].mxu1 %vm555_vm3, %v1156_v3  ;;  %v1349_v9 = vmul.f32 %v2642_v60, %v3340_v13 }
 0x419   : > { %2429 = vmatpush3.msra.mxu1 %v1351_v37  ;;  %v1348_v5 = vmul.f32 %v2644_v58, %v3342_v14  ;;  %v1930_v20 = vpop.permute.xlu0 %1929 }
 0x41a   : > { %2438 = vmatprep.subr.mxu1 %v3376_v38 }
 0x41b   : > { %v2646_v12 = vpop.eup %2645  ;;  %2430 = vmatprep.mubr.msk.f32.mxu1 %vm555_vm3, %v1348_v5  ;;  %v1924_v4 = vpop.xlane.xlu1 %1923 }
 0x41c   : > { %v2648_v8 = vpop.eup %2647  ;;  %2431 = vmatmul.mubr.msk.f32.vlgmr.msra.gmra.mrb[10].mxu1 %vm555_vm3, %v1349_v9  ;;  %v1542_v7 = vmul.f32 %v2646_v12, %v3350_v24  ;;  %2653 = vrcp.f32 %v1924_v4 }
 0x41d   : > { %2439 = vmatpush3.msra.mxu1 %v3376_v38  ;;  %v1541_v6 = vmul.f32 %v2648_v8, %v3352_v26 }
 0x41f   : > { %2440 = vmatprep.mubr.msk.f32.mxu1 %vm555_vm3, %v1541_v6  ;;  %v1921_v14 = vpop.xlane.xlu1 %1920 }
 0x420   : > { %v2650_v13 = vpop.eup %2649  ;;  %2655 = vrcp.f32 %v1921_v14  ;;  %2441 = vmatmul.mubr.msk.f32.vlgmr.msra.gmra.mrb[12].mxu1 %vm555_vm3, %v1542_v7 }
 0x421   : > { %v2652_v15 = vpop.eup %2651  ;;  %v1734_v16 = vmul.f32 %v2650_v13, %v3360_v28 }
 0x422   : > { %v1735_v19 = vmul.f32 %v2652_v15, %v3358_v11 }
 0x423   : > { %2450 = vmatprep.mubr.msk.f32.mxu1 %vm555_vm3, %v1734_v16  ;;  %v1737_v18 = vpop.permute.xlu1 %1736 }
 0x424   : > { %2448 = vmatprep.subr.mxu1 %v1737_v18 }
 0x425   : > { %2449 = vmatpush3.msra.mxu1 %v1737_v18 }
 0x426   : > { %2451 = vmatmul.mubr.msk.f32.vlgmr.msra.gmra.mrb[14].mxu1 %vm555_vm3, %v1735_v19  ;;  %2458 = vmatprep.subr.mxu1 %v1930_v20  ;;  %v2654_v22 = vpop.eup %2653 }
 0x427   : > { %2459 = vmatpush3.msra.mxu1 %v1930_v20  ;;  %v1928_v26 = vmul.f32 %v2654_v22, %v3366_v31 }
 0x42a   : > { %v2656_v24 = vpop.eup %2655 }
 0x42b   : > { %v1927_v25 = vmul.f32 %v2656_v24, %v3370_v33 }
 0x42d   : > { %2460 = vmatprep.mubr.msk.f32.mxu1 %vm555_vm3, %v1927_v25 }
 0x42e   : > { %2461 = vmatmul.mubr.msk.f32.vlgmr.msra.gmra.mrb[16].mxu1 %vm555_vm3, %v1928_v26 }
 0x49d   : > { %v2392_v10 = vpop.f32.mrb[2].mxu1 }
 0x49e   : > { %v653_v27 = vpop.f32.mrb[3].mxu1 }
 0x4e3   : > { %v2402_v11 = vpop.f32.mrb[4].mxu1 }
 0x4e4   : > { %2017 = vrot.lane.b32.xlu0 %v2402_v11, %s2893_s3  ;;  %v846_v28 = vpop.f32.mrb[5].mxu1 }
 0x4e5   : > { %2015 = vrot.lane.b32.xlu1 %v846_v28, %s2893_s3 }
 0x4e7   : > { %v2412_v29 = vpop.f32.mrb[6].mxu1 }
 0x4e8   : > { %2025 = vrot.lane.b32.xlu0 %v2412_v29, %s2894_s25  ;;  %v1039_v30 = vpop.f32.mrb[7].mxu1 }
 0x4e9   : > { %2023 = vrot.lane.b32.xlu1 %v1039_v30, %s2894_s25 }
 0x4eb   : > { %v2422_v32 = vpop.f32.mrb[8].mxu1 }
 0x4ec   : > { %2033 = vrot.lane.b32.xlu0 %v2422_v32, %s2895_s12  ;;  %v1232_v31 = vpop.f32.mrb[9].mxu1 }
 0x4ed   : > { %2031 = vrot.lane.b32.xlu1 %v1232_v31, %s2895_s12 }
 0x4ef   : > { %v2432_v33 = vpop.f32.mrb[10].mxu1 }
 0x4f0   : > { %2041 = vrot.lane.b32.xlu0 %v2432_v33, %s2896_s21  ;;  %v1425_v34 = vpop.f32.mrb[11].mxu1 }
 0x4f1   : > { %2039 = vrot.lane.b32.xlu1 %v1425_v34, %s2896_s21 }
 0x4f3   : > { %v2442_v35 = vpop.f32.mrb[12].mxu1 }
 0x4f4   : > { %2049 = vrot.lane.b32.xlu0 %v2442_v35, %s2897_s23  ;;  %v1618_v36 = vpop.f32.mrb[13].mxu1 }
 0x4f5   : > { %2047 = vrot.lane.b32.xlu1 %v1618_v36, %s2897_s23 }
 0x4f9   : > { %v2452_v37 = vpop.f32.mrb[14].mxu1 }
 0x4fa   : > { %2057 = vrot.lane.b32.xlu0 %v2452_v37, %s2898_s6  ;;  %v1811_v38 = vpop.f32.mrb[15].mxu1 }
 0x4fb   : > { %2055 = vrot.lane.b32.xlu1 %v1811_v38, %s2898_s6 }
 0x501   : > { %v2462_v39 = vpop.f32.mrb[16].mxu1 }
 0x502   : > { %2065 = vrot.lane.b32.xlu0 %v2462_v39, %s2899_s14  ;;  %v2004_v40 = vpop.f32.mrb[17].mxu1 }
 0x503   : > { %2063 = vrot.lane.b32.xlu1 %v2004_v40, %s2899_s14 }
 0x556   : > { %v2018_v41 = vpop.permute.xlu0 %2017 }
 0x557   : > { %v2016_v42 = vpop.permute.xlu1 %2015  ;;  %v2070_v21 = vsel %vm470_vm2, %v2392_v10, %v2018_v41 }
 0x558   : > { %v2069_v52 = vsel %vm470_vm2, %v653_v27, %v2016_v42 }
 0x55a   : > { %v2026_v43 = vpop.permute.xlu0 %2025 }
 0x55b   : > { %v2024_v44 = vpop.permute.xlu1 %2023  ;;  %v2072_v53 = vsel %vm555_vm3, %v2070_v21, %v2026_v43 }
 0x55c   : > { %v2071_v45 = vsel %vm555_vm3, %v2069_v52, %v2024_v44 }
 0x55e   : > { %v2034_v17 = vpop.permute.xlu0 %2033 }
 0x55f   : > { %v2032_v46 = vpop.permute.xlu1 %2031  ;;  %v2075_v55 = vsel %vm2073_vm4, %v2072_v53, %v2034_v17 }
 0x560   : > { %v2074_v57 = vsel %vm2073_vm4, %v2071_v45, %v2032_v46 }
 0x562   : > { %v2042_v47 = vpop.permute.xlu0 %2041 }
 0x563   : > { %v2040_v49 = vpop.permute.xlu1 %2039  ;;  %v2078_v59 = vsel %vm2076_vm5, %v2075_v55, %v2042_v47 }
 0x564   : > { %v2077_v61 = vsel %vm2076_vm5, %v2074_v57, %v2040_v49 }
 0x566   : > { %v2050_v51 = vpop.permute.xlu0 %2049 }
 0x567   : > { %v2048_v23 = vpop.permute.xlu1 %2047  ;;  %v2081_v62 = vsel %vm2079_vm6, %v2078_v59, %v2050_v51 }
 0x568   : > { %v2080_v63 = vsel %vm2079_vm6, %v2077_v61, %v2048_v23 }
 0x56c   : > { %v2058_v54 = vpop.permute.xlu0 %2057 }
 0x56d   : > { %v2056_v56 = vpop.permute.xlu1 %2055  ;;  %v2084_v50 = vsel %vm2082_vm7, %v2081_v62, %v2058_v54 }
 0x56e   : > { %v2083_v0 = vsel %vm2082_vm7, %v2080_v63, %v2056_v56 }
 0x574   : > { %v2066_v48 = vpop.permute.xlu0 %2065 }
 0x575   : > { %v2087_v1 = vsel %vm2085_vm8, %v2084_v50, %v2066_v48  ;;  %v2064_v2 = vpop.permute.xlu1 %2063 }
 0x576   : > { %2089 = vst.msk [vmem:[%s299_s5 + $0x8] sm:$0xff] %vm309_vm1, %v2087_v1  ;;  %v2086_v3 = vsel %vm2085_vm8, %v2083_v0, %v2064_v2 }
 0x577   : > { %2088 = vst.msk [vmem:[%s299_s5] sm:$0xff] %vm309_vm1, %v2086_v3 }
 0x578   : > { %2786 = shalt.err (!%p2783_p7)
}
 0x579   : > { %s2787_s13 = scalar_lea.hbm %s3427_s2, 256  ;;  %s2791_s12 = scalar_lea.hbm %s3483_s4, 512 }
 0x57a   : > { %p2788_p13 = scmp.ne.s32.totalorder %s3427_s2, %s2787_s13  ;;  %p2792_p1 = scmp.lt.u32.totalorder %s3427_s2, %s3483_s4 }
 0x57b   : > { %p2793_p11 = scmp.lt.u32.totalorder %s2791_s12, %s2787_s13  ;;  %p2795_p2 = scmp.lt.u32.totalorder %s2787_s13, %s3427_s2 }
 0x57c   : > { %p2789_p8 = pnand %p2788_p13, %p3512_p6 }
 0x57d   : > { %p2794_p0 = por %p2793_p11, %p2792_p1 }
 0x57e   : > { %p2790_p12 = pneg %p2789_p8 }
 0x57f   : > { %p2796_p10 = por %p2795_p2, %p2794_p0 }
 0x581   : > { %p2797_p3 = pnand %p2796_p10, %p2790_p12 }
 0x583   : > { %2800 = shalt.err (!%p2797_p3)
}
 0x584   : > { %s2901_s6 = smov 128  }
 0x585   : > { %2489 = dma.vmem_to_hbm [thread:$0]  (%p3512_p6), %s3422_s10, 256, %s3427_s2, %s2091_s18, %s2901_s6, %s2901_s6, %s2894_s25  }
 0x586 PF: > { %s2121_s14 = sand.u32 1, %s2847_s15   ;;  %p3513_p4 = scmp.ne.s32.totalorder %s3494_s24, 0 }
 0x587   : > { %p3514_p9 = scmp.ge.s32.totalorder %s2867_s20, 2  ;;  %s2122_s5 = scalar_lea.sflag [#allocation4], %s2121_s14 }
 0x589   : > { %p2506_p5 = pnand %p3514_p9, %p3513_p4 }
 0x58b   : > { %2842 = dma.done.wait (!%p2506_p5), %s2122_s5, 256  }
 0x58c   : > { %2844 = vsyncadd (!%p2506_p5), %s2122_s5, 4294967040  ;;  %s24_s20 = sadd.s32 1, %s2867_s20   ;;  %s3515_s26 = sld [smem:[#allocation16_spill]] }
 0x58d   : > { %p21_p7 = scmp.ge.s32.totalorder %s24_s20, 4   ;;  %s3516_s15 = smov %s2851_s16 }
 0x58e   : > { %s3517_s16 = smov %s2855_s17  ;;  %s3518_s17 = smov %s3074_s7 }
 0x58f   : > { %s3519_s18 = smov %s2863_s19  ;;  %23 = sbr.rel (!%p21_p7) target bundleno = 13 (0xd), region = 102 }
 0x592   : > { %s3520_s19 = smov %s3515_s26 }
 0x596   :  { %2127 = vsyncpa [#allocation3], 1 }
 0x597   :  { %2129 = vsyncpa [#allocation3 + $0x1], 1 }
 0x598   :  { %2130 = vsyncpa [#allocation6], 1 }
 0x599   :  { %2132 = vsyncpa [#allocation6 + $0x1], 1 }
 0x59a   :  { %2133 = vsyncpa [#allocation9], 1 }
 0x59b   :  { %2134 = vsyncpa [#allocation4], 1 }
 0x59c   :  { %2136 = vsyncpa [#allocation4 + $0x1], 1 }

</bundles_post_ra>
